<compile_context>
chip_gen: v6e
topology: v6e:2x2x1
jax: 0.10.0
libtpu: 0.0.40
codegen_flags: <defaults>
</compile_context>

<pallas_src>
import jax
import jax.numpy as jnp
from jax.experimental import pallas as pl
from jax.experimental.pallas import tpu as pltpu


def _round_up(n, m):
    return (n + m - 1) // m * m


def _ffn_kernel(x_ref, w1_ref, w2_ref, w3_ref, o_ref, acc_ref):
    # x_ref  : (tm, E)   activation row tile (native dtype, fed straight to MXU)
    # w1_ref : (E, th)   fc1 weight slice (pre-transposed)
    # w2_ref : (E, th)   fc2 weight slice (pre-transposed)
    # w3_ref : (th, E)   fc3 weight slice (pre-transposed)
    # o_ref  : (tm, E)   output row tile
    # acc_ref: (tm, E)   f32 accumulator, resident across the hidden-dim axis
    h = pl.program_id(1)

    @pl.when(h == 0)
    def _init():
        acc_ref[...] = jnp.zeros_like(acc_ref)

    x = x_ref[...]  # no up-cast: bf16/f32 goes straight to the MXU
    x1 = jnp.dot(x, w1_ref[...], preferred_element_type=jnp.float32)
    x2 = jnp.dot(x, w2_ref[...], preferred_element_type=jnp.float32)

    # SiLU(x1) * x2 in f32 (sigmoid on the EUP, mul on the VPU).
    g = (x1 * jax.nn.sigmoid(x1)) * x2

    acc_ref[...] += jnp.dot(g.astype(w3_ref.dtype), w3_ref[...],
                            preferred_element_type=jnp.float32)

    @pl.when(h == pl.num_programs(1) - 1)
    def _writeback():
        o_ref[...] = acc_ref[...].astype(o_ref.dtype)


def feed_forward(x, w1t, w2t, w3t, *, tile_m=256, tile_h=512):
    """SwiGLU FFN: (silu(x @ W1^T) * (x @ W2^T)) @ W3^T.

    x   : [B, S, E]
    w1t : [E, H]  fc1 weight, pre-transposed once at parameter init
    w2t : [E, H]  fc2 weight, pre-transposed once at parameter init
    w3t : [H, E]  fc3 weight, pre-transposed once at parameter init
    """
    B, S, E = x.shape
    H = w1t.shape[1]
    M = B * S

    # ---- tile selection ------------------------------------------------------
    tm = min(_round_up(tile_m, 8), _round_up(M, 8))   # row tile (sublane-aligned)
    Hp = _round_up(H, 128)                            # lane-align hidden dim
    th = min(_round_up(tile_h, 128), Hp)              # hidden-dim slice (lane-aligned)
    Hp = _round_up(Hp, th)                            # make th divide the padded H
    gm = _round_up(M, tm) // tm
    gh = Hp // th

    # Pad token axis to a multiple of tm (zero rows -> zero output rows).
    Mp = gm * tm
    x2d = x.reshape(M, E)
    if Mp != M:
        x2d = jnp.pad(x2d, ((0, Mp - M), (0, 0)))

    # Pad hidden axis with zero columns/rows: silu(0)*0 @ 0-rows contributes 0.
    # TODO(synk): in a real model this padding lives at parameter init, not per call.
    if Hp != H:
        w1t = jnp.pad(w1t, ((0, 0), (0, Hp - H)))
        w2t = jnp.pad(w2t, ((0, 0), (0, Hp - H)))
        w3t = jnp.pad(w3t, ((0, Hp - H), (0, 0)))

    # ---- VMEM budget: double-buffered tiles + f32 accumulator ----------------
    ib = x.dtype.itemsize
    vmem_bytes = 2 * (tm * E * ib          # x tile
                      + 2 * E * th * ib    # w1 / w2 tiles
                      + th * E * ib        # w3 tile
                      + tm * E * ib)       # out tile
    vmem_bytes += tm * E * 4               # accumulator
    vmem_bytes = int(min(max(int(vmem_bytes * 1.3) + (2 << 20), 32 << 20), 96 << 20))

    cost = pl.CostEstimate(
        flops=6 * M * E * H,                       # three M*E*H matmuls
        transcendentals=M * H,                     # sigmoid
        bytes_accessed=int((x2d.size + w1t.size + w2t.size + w3t.size
                            + Mp * E) * ib))

    out2d = pl.pallas_call(
        _ffn_kernel,
        out_shape=jax.ShapeDtypeStruct((Mp, E), x.dtype),
        grid_spec=pltpu.PrefetchScalarGridSpec(
            num_scalar_prefetch=0,
            grid=(gm, gh),
            in_specs=[
                pl.BlockSpec((tm, E), lambda i, h: (i, 0)),   # x row tile (resident over h)
                pl.BlockSpec((E, th), lambda i, h: (0, h)),   # W1^T hidden slice
                pl.BlockSpec((E, th), lambda i, h: (0, h)),   # W2^T hidden slice
                pl.BlockSpec((th, E), lambda i, h: (h, 0)),   # W3^T hidden slice
            ],
            out_specs=pl.BlockSpec((tm, E), lambda i, h: (i, 0)),
            scratch_shapes=[pltpu.VMEM((tm, E), jnp.float32)],
        ),
        compiler_params=pltpu.CompilerParams(
            dimension_semantics=("parallel", "arbitrary"),
            vmem_limit_bytes=vmem_bytes),
        cost_estimate=cost,
    )(x2d, w1t, w2t, w3t)

    if Mp != M:
        out2d = out2d[:M]
    return out2d.reshape(B, S, E)


if __name__ == "__main__":
    # Small but lane-aligned config (E, H multiples of 128).
    B, S = 2, 8
    emb_dim, hidden_dim = 128, 256

    key = jax.random.PRNGKey(0)
    kx, k1, k2, k3 = jax.random.split(key, 4)

    x = jax.random.normal(kx, (B, S, emb_dim), dtype=jnp.float32)
    # nn.Linear(in, out, bias=False) weights have shape [out, in].
    w1 = jax.random.normal(k1, (hidden_dim, emb_dim), dtype=jnp.float32) * 0.05
    w2 = jax.random.normal(k2, (hidden_dim, emb_dim), dtype=jnp.float32) * 0.05
    w3 = jax.random.normal(k3, (emb_dim, hidden_dim), dtype=jnp.float32) * 0.05

    # Pre-transpose ONCE (in a real model this lives at parameter init,
    # not on the per-call path).
    w1t, w2t, w3t = w1.T, w2.T, w3.T

    # tile_h=128 so the hidden-dim accumulation path is exercised even at
    # this small size (2 hidden-dim grid steps).
    y = feed_forward(x, w1t, w2t, w3t, tile_h=128)
    y = jax.block_until_ready(y)

    # Pure-JAX reference check.
    x1 = x @ w1.T
    x2 = x @ w2.T
    ref = (x1 * jax.nn.sigmoid(x1) * x2) @ w3.T
    assert y.shape == (B, S, emb_dim)
    assert jnp.allclose(y, ref, atol=2e-2, rtol=2e-2), "mismatch vs reference"

    print("KERNEL_OK")
</pallas_src>

<mosaic_0001>
module attributes {stable_mosaic.version = 11 : i64} {
  func.func @_ffn_kernel(%arg0: i32, %arg1: i32, %arg2: memref<16x128xf32, #tpu.memory_space<vmem>>, %arg3: memref<128x128xf32, #tpu.memory_space<vmem>>, %arg4: memref<128x128xf32, #tpu.memory_space<vmem>>, %arg5: memref<128x128xf32, #tpu.memory_space<vmem>>, %arg6: memref<16x128xf32, #tpu.memory_space<vmem>>, %arg7: memref<16x128xf32, #tpu.memory_space<vmem>>) attributes {dimension_semantics = [#tpu.dimension_semantics<parallel>, #tpu.dimension_semantics<arbitrary>], iteration_bounds = array<i64: 1, 2>, scalar_prefetch = 0 : i64, scratch_operands = 1 : i64, tpu.core_type = #tpu.core_type<tc>, window_params = [{transform_indices = @transform_0, window_bounds = array<i64: 16, 128>}, {transform_indices = @transform_1, window_bounds = array<i64: 128, 128>}, {transform_indices = @transform_2, window_bounds = array<i64: 128, 128>}, {transform_indices = @transform_3, window_bounds = array<i64: 128, 128>}, {transform_indices = @transform_4, window_bounds = array<i64: 16, 128>}]} {
    %c0_i32 = arith.constant 0 : i32
    %0 = arith.cmpi eq, %arg1, %c0_i32 : i32
    %1 = arith.extui %0 : i1 to i32
    %c0_i32_0 = arith.constant 0 : i32
    %2 = arith.cmpi ne, %1, %c0_i32_0 : i32
    scf.if %2 {
      %cst_16 = arith.constant 0.000000e+00 : f32
      %23 = vector.broadcast %cst_16 : f32 to vector<16x128xf32>
      %c0_17 = arith.constant 0 : index
      %c0_18 = arith.constant 0 : index
      %24 = vector.load %arg7[%c0_17, %c0_18] : memref<16x128xf32, #tpu.memory_space<vmem>>, vector<16x128xf32>
      tpu.vector_store %arg7[%c0_17, %c0_18], %23 {strides = array<i32>} : memref<16x128xf32, #tpu.memory_space<vmem>>, vector<16x128xf32>,
    } else {
    }
    %c0 = arith.constant 0 : index
    %c0_1 = arith.constant 0 : index
    %3 = vector.load %arg2[%c0, %c0_1] : memref<16x128xf32, #tpu.memory_space<vmem>>, vector<16x128xf32>
    %c0_2 = arith.constant 0 : index
    %c0_3 = arith.constant 0 : index
    %4 = vector.load %arg3[%c0_2, %c0_3] : memref<128x128xf32, #tpu.memory_space<vmem>>, vector<128x128xf32>
    %cst = arith.constant dense<0.000000e+00> : vector<16x128xf32>
    %5 = tpu.matmul %3, %4, %cst {dimension_numbers = #tpu.dot_dimension_numbers<[1], [0], [0], [1], [0, 0, 1, 1], [], []>} : vector<16x128xf32>, vector<128x128xf32>, vector<16x128xf32> -> vector<16x128xf32>
    %c0_4 = arith.constant 0 : index
    %c0_5 = arith.constant 0 : index
    %6 = vector.load %arg4[%c0_4, %c0_5] : memref<128x128xf32, #tpu.memory_space<vmem>>, vector<128x128xf32>
    %cst_6 = arith.constant dense<0.000000e+00> : vector<16x128xf32>
    %7 = tpu.matmul %3, %6, %cst_6 {dimension_numbers = #tpu.dot_dimension_numbers<[1], [0], [0], [1], [0, 0, 1, 1], [], []>} : vector<16x128xf32>, vector<128x128xf32>, vector<16x128xf32> -> vector<16x128xf32>
    %8 = arith.negf %5 : vector<16x128xf32>
    %9 = math.exp %8 : vector<16x128xf32>
    %cst_7 = arith.constant 1.000000e+00 : f32
    %10 = vector.broadcast %cst_7 : f32 to vector<16x128xf32>
    %11 = arith.addf %10, %9 : vector<16x128xf32>
    %12 = arith.divf %10, %11 : vector<16x128xf32>
    %13 = arith.mulf %5, %12 : vector<16x128xf32>
    %14 = arith.mulf %13, %7 : vector<16x128xf32>
    %c0_8 = arith.constant 0 : index
    %c0_9 = arith.constant 0 : index
    %15 = vector.load %arg7[%c0_8, %c0_9] : memref<16x128xf32, #tpu.memory_space<vmem>>, vector<16x128xf32>
    %c0_10 = arith.constant 0 : index
    %c0_11 = arith.constant 0 : index
    %16 = vector.load %arg5[%c0_10, %c0_11] : memref<128x128xf32, #tpu.memory_space<vmem>>, vector<128x128xf32>
    %cst_12 = arith.constant dense<0.000000e+00> : vector<16x128xf32>
    %17 = tpu.matmul %14, %16, %cst_12 {dimension_numbers = #tpu.dot_dimension_numbers<[1], [0], [0], [1], [0, 0, 1, 1], [], []>} : vector<16x128xf32>, vector<128x128xf32>, vector<16x128xf32> -> vector<16x128xf32>
    %18 = arith.addf %15, %17 : vector<16x128xf32>
    %c0_13 = arith.constant 0 : index
    %c0_14 = arith.constant 0 : index
    %19 = vector.load %arg7[%c0_13, %c0_14] : memref<16x128xf32, #tpu.memory_space<vmem>>, vector<16x128xf32>
    tpu.vector_store %arg7[%c0_13, %c0_14], %18 {strides = array<i32>} : memref<16x128xf32, #tpu.memory_space<vmem>>, vector<16x128xf32>,
    %c1_i32 = arith.constant 1 : i32
    %20 = arith.cmpi eq, %arg1, %c1_i32 : i32
    %21 = arith.extui %20 : i1 to i32
    %c0_i32_15 = arith.constant 0 : i32
    %22 = arith.cmpi ne, %21, %c0_i32_15 : i32
    scf.if %22 {
      %c0_16 = arith.constant 0 : index
      %c0_17 = arith.constant 0 : index
      %23 = vector.load %arg7[%c0_16, %c0_17] : memref<16x128xf32, #tpu.memory_space<vmem>>, vector<16x128xf32>
      %c0_18 = arith.constant 0 : index
      %c0_19 = arith.constant 0 : index
      %24 = vector.load %arg6[%c0_18, %c0_19] : memref<16x128xf32, #tpu.memory_space<vmem>>, vector<16x128xf32>
      tpu.vector_store %arg6[%c0_18, %c0_19], %23 {strides = array<i32>} : memref<16x128xf32, #tpu.memory_space<vmem>>, vector<16x128xf32>,
    } else {
    }
    return
  }
  func.func @transform_0(%arg0: i32, %arg1: i32) -> (i32, i32) {
    %c0_i32 = arith.constant 0 : i32
    %c0_i32_0 = arith.constant 0 : i32
    return %arg0, %c0_i32 : i32, i32
  }
  func.func @transform_1(%arg0: i32, %arg1: i32) -> (i32, i32) {
    %c0_i32 = arith.constant 0 : i32
    %c0_i32_0 = arith.constant 0 : i32
    return %c0_i32, %arg1 : i32, i32
  }
  func.func @transform_2(%arg0: i32, %arg1: i32) -> (i32, i32) {
    %c0_i32 = arith.constant 0 : i32
    %c0_i32_0 = arith.constant 0 : i32
    return %c0_i32, %arg1 : i32, i32
  }
  func.func @transform_3(%arg0: i32, %arg1: i32) -> (i32, i32) {
    %c0_i32 = arith.constant 0 : i32
    %c0_i32_0 = arith.constant 0 : i32
    return %arg1, %c0_i32 : i32, i32
  }
  func.func @transform_4(%arg0: i32, %arg1: i32) -> (i32, i32) {
    %c0_i32 = arith.constant 0 : i32
    %c0_i32_0 = arith.constant 0 : i32
    return %arg0, %c0_i32 : i32, i32
  }
}

</mosaic_0001>

<bundles_post_ra>
// kernel: tpu_custom_call.1
= control target key start
LH: loop header
LB: loop body
LE: loop exit
PB: predicated region body
PF: predicated region fallthrough
CT: control target
= control target key end

     0   :  { %9 = vsyncpa [#allocation4], 0  ;;  %s1535_s0 = inlined_call_operand.hbm [shape: f32[16,128], index: 0, kind: input, shape index: {}]   ;;  %s1536_s1 = inlined_call_operand.hbm [shape: f32[128,256], index: 1, kind: input, shape index: {}]   ;;  %s1537_s2 = inlined_call_operand.hbm [shape: f32[128,256], index: 2, kind: input, shape index: {}]   ;;  %s1538_s3 = inlined_call_operand.hbm [shape: f32[256,128], index: 3, kind: input, shape index: {}]   ;;  %s1539_s4 = inlined_call_operand.hbm [shape: f32[16,128], index: 4, kind: output, shape index: {}]  }
   0x1   :  { %10 = vsyncpa [#allocation7], 0 }
   0x2   :  { %12 = vsyncpa [#allocation7 + $0x1], 0 }
   0x3   :  { %13 = vsyncpa [#allocation10], 0 }
   0x4   :  { %15 = vsyncpa [#allocation10 + $0x1], 0 }
   0x5   :  { %16 = vsyncpa [#allocation5], 0  ;;  %s1278_s15 = smov 0   ;;  %s1280_s16 = smov 0  }
   0x6   :  { %s1282_s17 = smov 0   ;;  %s1284_s18 = smov 0  }
   0x7   :  { %s1286_s19 = smov 0   ;;  %s1288_s20 = smov 0  }
   0x8 LB: > { %s31_s21 = sadd.s32 1, %s1236_s19  ;;  %s67_s22 = sadd.s32 1, %s1228_s17  ;;  %s1240_s20 = sphi %s1288_s20, %s22_s20   ;;  %s1236_s19 = sphi %s1286_s19, %s1549_s19   ;;  %s1232_s18 = sphi %s1284_s18, %s1548_s18   ;;  %s1228_s17 = sphi %s1282_s17, %s1547_s17   ;;  %s1224_s16 = sphi %s1280_s16, %s1546_s16   ;;  %s1220_s15 = sphi %s1278_s15, %s1545_s15  }
   0x9   : > { %p32_p0 = scmp.ge.s32.totalorder %s31_s21, 2  ;;  %p74_p1 = scmp.ne.s32.totalorder %s1228_s17, %s1224_s16 }
   0xa   : > { %p75_p2 = scmp.eq.s32.totalorder %s1240_s20, 0  ;;  %p976_p5 = scmp.lt.s32.totalorder %s1240_s20, 2 }
   0xb   : > { %s1551_s21 = smov (%p32_p0, %s31_s21), 0  ;;  %s198_s25 = sand.u32 1, %s1240_s20  }
   0xc   : > { %p1315_p3 = por %p75_p2, %p74_p1  ;;  %s64_s24 = ssub.s32 %s1236_s19, %s1551_s21 }
   0xd   : > { %p65_p4 = scmp.eq.s32.totalorder %s64_s24, 0  ;;  %s200_s26 = sand.u32 1, %s1228_s17  }
   0xe   : > { %s1329_s28 = sshll.u32 %s200_s26, 7  ;;  %s768_s29 = sshll.u32 %s1236_s19, 7 }
   0xf   : > { %s1325_s27 = scalar_select %p65_p4, %s1228_s17, %s67_s22  }
  0x10   : > { %s207_s6 = scalar_lea.hbm %s1536_s1, %s768_s29  ;;  %s202_s7 = scalar_lea.vmem [#allocation6], %s1329_s28 }
  0x11   : > { %s208_s8 = sshll.u32 %s202_s7, 4  ;;  %p1338_p6 = pnand %p976_p5, %p1315_p3  ;;  %s209_s8 = int_to_ptr.vmem [resolvable:$true] %s208_s8 }
  0x12   : > { %s1345_s12 = scalar_lea.hbm %s1537_s2, %s768_s29  ;;  %s1347_s13 = scalar_lea.sflag [#allocation7], %s198_s25 }
  0x13   : > { %p1046_p7 = pneg %p1338_p6  ;;  %s1057_s14 = scalar_lea.vmem %s209_s8, 2048 }
  0x14   : > { %p1058_p8 = scmp.ne.s32.totalorder %s209_s8, %s1057_s14  ;;  %s1242_s22 = smov [#allocation6]  }
  0x15   : > { %s1062_s23 = sshll.u32 %s1242_s22, 4  ;;  %s1063_s23 = int_to_ptr.vmem [resolvable:$false] %s1062_s23 }
  0x16   : > { %p1060_p9 = pnand %p1058_p8, %p1046_p7  ;;  %s1064_s24 = scalar_lea.vmem %s1063_s23, 4096 }
  0x17   : > { %p1065_p11 = scmp.lt.s32.totalorder %s209_s8, %s1063_s23  ;;  %p1066_p12 = scmp.lt.s32.totalorder %s1064_s24, %s1057_s14 }
  0x18   : > { %p1061_p10 = pneg %p1060_p9 }
  0x19   : > { %p1067_p13 = por %p1066_p12, %p1065_p11 }
  0x1b   : > { %p1068_p0 = pnand %p1067_p13, %p1061_p10 }
  0x1d   : > { %1071 = shalt.err (!%p1068_p0)
}
  0x1e   : > { %s1243_s29 = smov 256   ;;  %s1244_s25 = smov 128  }
  0x1f   : > { %s1245_s30 = smov 8   ;;  %s1361_s5 = sadd.s32 4294967295, %s1240_s20  }
  0x20   : > { %968 = dma.hbm_to_vmem [thread:$0]  (!%p1338_p6), %s207_s6, 2048, %s209_s8, %s1347_s13, %s1243_s29, %s1244_s25, %s1245_s30  }
  0x21   : > { %p80_p1 = scmp.ne.s32.totalorder %s1224_s16, %s1220_s15  ;;  %p81_p2 = scmp.eq.s32.totalorder %s1361_s5, 0 }
  0x22   : > { %p764_p3 = scmp.ge.s32.totalorder %s1240_s20, 1  ;;  %p169_p4 = scmp.lt.s32.totalorder %s1240_s20, 3 }
  0x23   : > { %p1370_p5 = por %p81_p2, %p80_p1  ;;  %s1246_s6 = smov [#allocation3]  }
  0x24   : > { %p1374_p8 = pnand %p764_p3, %p169_p4  ;;  %s184_s8 = sshll.u32 %s1246_s6, 4  ;;  %s1380_s8 = int_to_ptr.vmem [resolvable:$true] %s184_s8 }
  0x25   : > { %s222_s15 = scalar_lea.vmem [#allocation8], %s1329_s28  ;;  %s1247_s23 = smov [#allocation8]  }
  0x26   : > { %p961_p9 = pneg %p1374_p8  ;;  %s228_s11 = sshll.u32 %s222_s15, 4  ;;  %s229_s11 = int_to_ptr.vmem [resolvable:$true] %s228_s11 }
  0x27   : > { %s1085_s22 = scalar_lea.vmem %s229_s11, 2048  ;;  %s1090_s24 = sshll.u32 %s1247_s23, 4  ;;  %s1091_s24 = int_to_ptr.vmem [resolvable:$false] %s1090_s24 }
  0x28   : > { %p1385_p10 = pnand %p961_p9, %p81_p2  ;;  %p1086_p11 = scmp.ne.s32.totalorder %s229_s11, %s1085_s22 }
  0x29   : > { %s1092_s6 = scalar_lea.vmem %s1091_s24, 4096  ;;  %p1093_p0 = scmp.lt.s32.totalorder %s229_s11, %s1091_s24 }
  0x2a   : > { %p1088_p12 = pnand %p1086_p11, %p1046_p7  ;;  %p1094_p1 = scmp.lt.s32.totalorder %s1092_s6, %s1085_s22 }
  0x2c   : > { %p1089_p13 = pneg %p1088_p12  ;;  %p1095_p3 = por %p1094_p1, %p1093_p0 }
  0x2e   : > { %p1096_p4 = pnand %p1095_p3, %p1089_p13 }
  0x30   : > { %1099 = shalt.err (!%p1096_p4)
}
  0x31   : > { %971 = dma.hbm_to_vmem [thread:$0]  (!%p1338_p6), %s1345_s12, 2048, %s229_s11, %s1347_s13, %s1243_s29, %s1244_s25, %s1245_s30  }
  0x32   : > { %p1102_p9 = pneg %p1385_p10  ;;  %s1111_s15 = scalar_lea.vmem %s1380_s8, 256 }
  0x33   : > { %p1112_p11 = scmp.ne.s32.totalorder %s1380_s8, %s1111_s15  ;;  %p1119_p13 = scmp.lt.s32.totalorder %s1380_s8, %s1380_s8 }
  0x34   : > { %p1120_p1 = scmp.lt.s32.totalorder %s1111_s15, %s1111_s15 }
  0x35   : > { %p1114_p12 = pnand %p1112_p11, %p1102_p9 }
  0x36   : > { %p1121_p3 = por %p1120_p1, %p1119_p13 }
  0x37   : > { %p1115_p0 = pneg %p1114_p12 }
  0x39   : > { %p1122_p4 = pnand %p1121_p3, %p1115_p0 }
  0x3b   : > { %1125 = shalt.err (!%p1122_p4)
}
  0x3c   : > { %964 = dma.hbm_to_vmem [thread:$0]  (!%p1385_p10), %s1535_s0, 256, %s1380_s8, [#allocation4], %s1244_s25, %s1244_s25, %s1245_s30  }
  0x3d   : > { %s787_s13 = sshll.u32 %s1236_s19, 11  ;;  %s242_s29 = scalar_lea.vmem [#allocation9], %s1329_s28 }
  0x3e   : > { %s249_s11 = sshll.u32 %s242_s29, 4  ;;  %s248_s6 = scalar_lea.hbm %s1538_s3, %s787_s13  ;;  %s250_s11 = int_to_ptr.vmem [resolvable:$true] %s249_s11 }
  0x3f   : > { %s239_s14 = scalar_lea.sflag [#allocation10], %s200_s26  ;;  %s1139_s15 = scalar_lea.vmem %s250_s11, 2048 }
  0x40   : > { %p1140_p9 = scmp.ne.s32.totalorder %s250_s11, %s1139_s15  ;;  %s1248_s22 = smov [#allocation9]  }
  0x41   : > { %s1144_s12 = sshll.u32 %s1248_s22, 4  ;;  %s1145_s12 = int_to_ptr.vmem [resolvable:$false] %s1144_s12 }
  0x42   : > { %p1142_p11 = pnand %p1140_p9, %p1046_p7  ;;  %s1146_s8 = scalar_lea.vmem %s1145_s12, 4096 }
  0x43   : > { %p1147_p10 = scmp.lt.s32.totalorder %s250_s11, %s1145_s12  ;;  %p1148_p0 = scmp.lt.s32.totalorder %s1146_s8, %s1139_s15 }
  0x44   : > { %p1143_p12 = pneg %p1142_p11 }
  0x45   : > { %p1149_p13 = por %p1148_p0, %p1147_p10 }
  0x47   : > { %p1150_p1 = pnand %p1149_p13, %p1143_p12 }
  0x49   : > { %1153 = shalt.err (!%p1150_p1)
}
  0x4a   : > { %974 = dma.hbm_to_vmem [thread:$0]  (!%p1338_p6), %s248_s6, 2048, %s250_s11, %s239_s14, %s1244_s25, %s1244_s25, %s1245_s30  }
  0x4b   : > { %261 = sbr.rel (%p1374_p8) target bundleno = 584 (0x248), region = 36 }
  0x50   : > { %1203 = dma.done.wait (%p81_p2), [#allocation4], 256  }
  0x51   : > { %1205 = vsyncadd (%p81_p2), [#allocation4], 4294967040  ;;  %s267_s26 = sand.u32 1, %s1361_s5   ;;  %s269_s28 = sand.u32 1, %s1224_s16  }
  0x52   : > { %s776_s13 = sshll.u32 %s269_s28, 7  ;;  %s268_s9 = scalar_lea.sflag [#allocation7], %s267_s26 }
  0x53   : > { %s1437_s29 = scalar_lea.vmem [#allocation6], %s776_s13 }
  0x54   : > { %1207 = dma.done.wait (%p1370_p5), %s268_s9, 4096  }
  0x55   : > { %1209 = vsyncadd (%p1370_p5), %s268_s9, 4294963200  ;;  %s1443_s25 = scalar_lea.vmem [#allocation8], %s776_s13  ;;  %s286_s30 = scalar_lea.sflag [#allocation10], %s269_s28 }
  0x56   : > { %s1445_s10 = scalar_lea.vmem [#allocation9], %s776_s13 }
  0x57   : > { %1211 = dma.done.wait (%p1370_p5), %s286_s30, 2048  }
  0x58   : > { %1213 = vsyncadd (%p1370_p5), %s286_s30, 4294965248  ;;  %p779_p6 = scmp.ne.s32.totalorder %s1232_s18, 0 }
  0x5a   : > { %325 = sbr.rel (%p779_p6) target bundleno = 97 (0x61), region = 56 }
  0x5f   : > { %v1249_v0 = vmov 0.0  }
  0x60   : > { %326 = vst [vmem:[#allocation2] sm:$0xff] %v1249_v0  ;;  %327 = vst [vmem:[#allocation2 + $0x8] sm:$0xff] %v1249_v0 }
  0x61 PF: > { %v345_v1 = vld [vmem:[%s1437_s29 + $0x78] sm:$0xff]  ;;  %v344_v2 = vld [vmem:[%s1437_s29 + $0x70] sm:$0xff]  ;;  %v343_v3 = vld [vmem:[%s1437_s29 + $0x68] sm:$0xff]  ;;  %p782_p7 = scmp.ne.s32.totalorder %s1232_s18, 1 }
  0x62   : > { %842 = vmatprep.subr.mxu0 %v345_v1  ;;  %v342_v4 = vld [vmem:[%s1437_s29 + $0x60] sm:$0xff]  ;;  %v1456_v5 = vld [vmem:[#allocation3] sm:$0xff]  ;;  %v341_v6 = vld [vmem:[%s1437_s29 + $0x58] sm:$0xff] }
  0x63   : > { %843 = vmatpush3.msra.mxu0 %v345_v1  ;;  %874 = vmatprep.mubr.f32.mxu0 %v1456_v5  ;;  %v436_v7 = vld [vmem:[%s1443_s25 + $0x78] sm:$0xff]  ;;  %v435_v8 = vld [vmem:[%s1443_s25 + $0x70] sm:$0xff]  ;;  %v434_v10 = vld [vmem:[%s1443_s25 + $0x68] sm:$0xff] }
  0x64   : > { %844 = vmatprep.subr.mxu0 %v344_v2  ;;  %877 = vmatprep.subr.mxu1 %v436_v7  ;;  %v340_v9 = vld [vmem:[%s1437_s29 + $0x50] sm:$0xff]  ;;  %v339_v11 = vld [vmem:[%s1437_s29 + $0x48] sm:$0xff]  ;;  %v433_v12 = vld [vmem:[%s1443_s25 + $0x60] sm:$0xff] }
  0x65   : > { %845 = vmatpush3.msra.mxu0 %v344_v2  ;;  %878 = vmatpush3.msra.mxu1 %v436_v7  ;;  %v338_v13 = vld [vmem:[%s1437_s29 + $0x40] sm:$0xff]  ;;  %v432_v14 = vld [vmem:[%s1443_s25 + $0x58] sm:$0xff]  ;;  %v431_v16 = vld [vmem:[%s1443_s25 + $0x50] sm:$0xff] }
  0x66   : > { %846 = vmatprep.subr.mxu0 %v343_v3  ;;  %879 = vmatprep.subr.mxu1 %v435_v8  ;;  %v337_v15 = vld [vmem:[%s1437_s29 + $0x38] sm:$0xff]  ;;  %v336_v17 = vld [vmem:[%s1437_s29 + $0x30] sm:$0xff]  ;;  %v430_v18 = vld [vmem:[%s1443_s25 + $0x48] sm:$0xff] }
  0x67   : > { %847 = vmatpush3.msra.mxu0 %v343_v3  ;;  %880 = vmatpush3.msra.mxu1 %v435_v8  ;;  %v335_v19 = vld [vmem:[%s1437_s29 + $0x28] sm:$0xff]  ;;  %v429_v20 = vld [vmem:[%s1443_s25 + $0x40] sm:$0xff]  ;;  %v428_v22 = vld [vmem:[%s1443_s25 + $0x38] sm:$0xff] }
  0x68   : > { %848 = vmatprep.subr.mxu0 %v342_v4  ;;  %881 = vmatprep.subr.mxu1 %v434_v10  ;;  %v334_v21 = vld [vmem:[%s1437_s29 + $0x20] sm:$0xff]  ;;  %v333_v23 = vld [vmem:[%s1437_s29 + $0x18] sm:$0xff]  ;;  %v427_v24 = vld [vmem:[%s1443_s25 + $0x30] sm:$0xff] }
  0x69   : > { %849 = vmatpush3.msra.mxu0 %v342_v4  ;;  %882 = vmatpush3.msra.mxu1 %v434_v10  ;;  %v332_v25 = vld [vmem:[%s1437_s29 + $0x10] sm:$0xff]  ;;  %v426_v26 = vld [vmem:[%s1443_s25 + $0x28] sm:$0xff]  ;;  %v425_v28 = vld [vmem:[%s1443_s25 + $0x20] sm:$0xff] }
  0x6a   : > { %850 = vmatprep.subr.mxu0 %v341_v6  ;;  %883 = vmatprep.subr.mxu1 %v433_v12  ;;  %v331_v27 = vld [vmem:[%s1437_s29 + $0x8] sm:$0xff]  ;;  %v330_v29 = vld [vmem:[%s1437_s29] sm:$0xff]  ;;  %v424_v30 = vld [vmem:[%s1443_s25 + $0x18] sm:$0xff] }
  0x6b   : > { %851 = vmatpush3.msra.mxu0 %v341_v6  ;;  %884 = vmatpush3.msra.mxu1 %v433_v12  ;;  %v329_v31 = vld [vmem:[#allocation3 + $0x8] sm:$0xff]  ;;  %v423_v32 = vld [vmem:[%s1443_s25 + $0x10] sm:$0xff]  ;;  %v422_v33 = vld [vmem:[%s1443_s25 + $0x8] sm:$0xff] }
  0x6c   : > { %852 = vmatprep.subr.mxu0 %v340_v9  ;;  %885 = vmatprep.subr.mxu1 %v432_v14  ;;  %v421_v34 = vld [vmem:[%s1443_s25] sm:$0xff]  ;;  %v545_v35 = vld [vmem:[%s1445_s10 + $0x78] sm:$0xff]  ;;  %v544_v36 = vld [vmem:[%s1445_s10 + $0x70] sm:$0xff] }
  0x6d   : > { %853 = vmatpush3.msra.mxu0 %v340_v9  ;;  %886 = vmatpush3.msra.mxu1 %v432_v14  ;;  %v543_v37 = vld [vmem:[%s1445_s10 + $0x68] sm:$0xff]  ;;  %v542_v38 = vld [vmem:[%s1445_s10 + $0x60] sm:$0xff]  ;;  %v541_v39 = vld [vmem:[%s1445_s10 + $0x58] sm:$0xff] }
  0x6e   : > { %854 = vmatprep.subr.mxu0 %v339_v11  ;;  %887 = vmatprep.subr.mxu1 %v431_v16  ;;  %v540_v40 = vld [vmem:[%s1445_s10 + $0x50] sm:$0xff]  ;;  %v539_v41 = vld [vmem:[%s1445_s10 + $0x48] sm:$0xff]  ;;  %v538_v42 = vld [vmem:[%s1445_s10 + $0x40] sm:$0xff] }
  0x6f   : > { %855 = vmatpush3.msra.mxu0 %v339_v11  ;;  %888 = vmatpush3.msra.mxu1 %v431_v16  ;;  %v537_v43 = vld [vmem:[%s1445_s10 + $0x38] sm:$0xff]  ;;  %v536_v44 = vld [vmem:[%s1445_s10 + $0x30] sm:$0xff]  ;;  %v535_v45 = vld [vmem:[%s1445_s10 + $0x28] sm:$0xff] }
  0x70   : > { %856 = vmatprep.subr.mxu0 %v338_v13  ;;  %889 = vmatprep.subr.mxu1 %v430_v18  ;;  %v534_v46 = vld [vmem:[%s1445_s10 + $0x20] sm:$0xff]  ;;  %v533_v47 = vld [vmem:[%s1445_s10 + $0x18] sm:$0xff]  ;;  %v532_v48 = vld [vmem:[%s1445_s10 + $0x10] sm:$0xff] }
  0x71   : > { %857 = vmatpush3.msra.mxu0 %v338_v13  ;;  %890 = vmatpush3.msra.mxu1 %v430_v18  ;;  %v531_v49 = vld [vmem:[%s1445_s10 + $0x8] sm:$0xff]  ;;  %v530_v50 = vld [vmem:[%s1445_s10] sm:$0xff] }
  0x72   : > { %858 = vmatprep.subr.mxu0 %v337_v15  ;;  %891 = vmatprep.subr.mxu1 %v429_v20  ;;  %v529_v3 = vld [vmem:[#allocation2 + $0x8] sm:$0xff] }
  0x73   : > { %859 = vmatpush3.msra.mxu0 %v337_v15  ;;  %892 = vmatpush3.msra.mxu1 %v429_v20 }
  0x74   : > { %860 = vmatprep.subr.mxu0 %v336_v17  ;;  %893 = vmatprep.subr.mxu1 %v428_v22 }
  0x75   : > { %861 = vmatpush3.msra.mxu0 %v336_v17  ;;  %894 = vmatpush3.msra.mxu1 %v428_v22 }
  0x76   : > { %862 = vmatprep.subr.mxu0 %v335_v19  ;;  %895 = vmatprep.subr.mxu1 %v427_v24 }
  0x77   : > { %863 = vmatpush3.msra.mxu0 %v335_v19  ;;  %896 = vmatpush3.msra.mxu1 %v427_v24 }
  0x78   : > { %864 = vmatprep.subr.mxu0 %v334_v21  ;;  %897 = vmatprep.subr.mxu1 %v426_v26 }
  0x79   : > { %865 = vmatpush3.msra.mxu0 %v334_v21  ;;  %898 = vmatpush3.msra.mxu1 %v426_v26 }
  0x7a   : > { %866 = vmatprep.subr.mxu0 %v333_v23  ;;  %899 = vmatprep.subr.mxu1 %v425_v28 }
  0x7b   : > { %867 = vmatpush3.msra.mxu0 %v333_v23  ;;  %900 = vmatpush3.msra.mxu1 %v425_v28 }
  0x7c   : > { %868 = vmatprep.subr.mxu0 %v332_v25  ;;  %901 = vmatprep.subr.mxu1 %v424_v30 }
  0x7d   : > { %869 = vmatpush3.msra.mxu0 %v332_v25  ;;  %902 = vmatpush3.msra.mxu1 %v424_v30 }
  0x7e   : > { %870 = vmatprep.subr.mxu0 %v331_v27  ;;  %903 = vmatprep.subr.mxu1 %v423_v32 }
  0x7f   : > { %871 = vmatpush3.msra.mxu0 %v331_v27  ;;  %904 = vmatpush3.msra.mxu1 %v423_v32 }
  0x80   : > { %872 = vmatprep.subr.mxu0 %v330_v29  ;;  %909 = vmatprep.mubr.f32.mxu1 %v1456_v5  ;;  %v528_v5 = vld [vmem:[#allocation2] sm:$0xff] }
  0x81   : > { %873 = vmatpush3.msra.mxu0 %v330_v29  ;;  %905 = vmatprep.subr.mxu1 %v422_v33 }
  0x82   : > { %875 = vmatmul.mubr.f32.vlgmr.msra.gmra.mxu0 %v329_v31  ;;  %906 = vmatpush3.msra.mxu1 %v422_v33 }
  0x83   : > { %907 = vmatprep.subr.mxu1 %v421_v34  ;;  %912 = vmatprep.subr.mxu0 %v545_v35 }
  0x84   : > { %908 = vmatpush3.msra.mxu1 %v421_v34  ;;  %913 = vmatpush3.msra.mxu0 %v545_v35 }
  0x85   : > { %910 = vmatmul.mubr.f32.vlgmr.msra.gmra.mxu1 %v329_v31  ;;  %914 = vmatprep.subr.mxu0 %v544_v36 }
  0x86   : > { %915 = vmatpush3.msra.mxu0 %v544_v36 }
  0x87   : > { %916 = vmatprep.subr.mxu0 %v543_v37 }
  0x88   : > { %917 = vmatpush3.msra.mxu0 %v543_v37 }
  0x89   : > { %918 = vmatprep.subr.mxu0 %v542_v38 }
  0x8a   : > { %919 = vmatpush3.msra.mxu0 %v542_v38 }
  0x8b   : > { %920 = vmatprep.subr.mxu0 %v541_v39 }
  0x8c   : > { %921 = vmatpush3.msra.mxu0 %v541_v39 }
  0x8d   : > { %922 = vmatprep.subr.mxu0 %v540_v40 }
  0x8e   : > { %923 = vmatpush3.msra.mxu0 %v540_v40 }
  0x8f   : > { %924 = vmatprep.subr.mxu0 %v539_v41 }
  0x90   : > { %925 = vmatpush3.msra.mxu0 %v539_v41 }
  0x91   : > { %926 = vmatprep.subr.mxu0 %v538_v42 }
  0x92   : > { %927 = vmatpush3.msra.mxu0 %v538_v42 }
  0x93   : > { %928 = vmatprep.subr.mxu0 %v537_v43 }
  0x94   : > { %929 = vmatpush3.msra.mxu0 %v537_v43 }
  0x95   : > { %930 = vmatprep.subr.mxu0 %v536_v44 }
  0x96   : > { %931 = vmatpush3.msra.mxu0 %v536_v44 }
  0x97   : > { %932 = vmatprep.subr.mxu0 %v535_v45 }
  0x98   : > { %933 = vmatpush3.msra.mxu0 %v535_v45 }
  0x99   : > { %934 = vmatprep.subr.mxu0 %v534_v46 }
  0x9a   : > { %935 = vmatpush3.msra.mxu0 %v534_v46 }
  0x9b   : > { %936 = vmatprep.subr.mxu0 %v533_v47 }
  0x9c   : > { %937 = vmatpush3.msra.mxu0 %v533_v47 }
  0x9d   : > { %938 = vmatprep.subr.mxu0 %v532_v48 }
  0x9e   : > { %939 = vmatpush3.msra.mxu0 %v532_v48 }
  0x9f   : > { %940 = vmatprep.subr.mxu0 %v531_v49 }
  0xa0   : > { %941 = vmatpush3.msra.mxu0 %v531_v49 }
  0xa1   : > { %942 = vmatprep.subr.mxu0 %v530_v50 }
  0xa2   : > { %943 = vmatpush3.msra.mxu0 %v530_v50 }
 0x142   : > { %v876_v51 = vpop.f32.mrf.mxu0 }
 0x143   : > { %v781_v52 = vmul.f32 -1.442695, %v876_v51 }
 0x144   : > { %v412_v53 = vpop.f32.mrf.mxu0 }
 0x145   : > { %1036 = vpow2.f32 %v781_v52  ;;  %v780_v54 = vmul.f32 -1.442695, %v412_v53  ;;  %v911_v60 = vpop.f32.mrf.mxu1 }
 0x147   : > { %1038 = vpow2.f32 %v780_v54  ;;  %v503_v0 = vpop.f32.mrf.mxu1 }
 0x152   : > { %v1037_v55 = vpop.eup %1036 }
 0x153   : > { %v519_v56 = vadd.f32 1.0, %v1037_v55 }
 0x154   : > { %v1039_v57 = vpop.eup %1038 }
 0x155   : > { %1040 = vrcp.f32 %v519_v56  ;;  %v518_v58 = vadd.f32 1.0, %v1039_v57 }
 0x157   : > { %1042 = vrcp.f32 %v518_v58 }
 0x162   : > { %v1041_v59 = vpop.eup %1040 }
 0x163   : > { %v525_v62 = vmul.f32 %v1041_v59, %v876_v51 }
 0x164   : > { %v1043_v61 = vpop.eup %1042 }
 0x165   : > { %v524_v63 = vmul.f32 %v1043_v61, %v412_v53  ;;  %v527_v2 = vmul.f32 %v911_v60, %v525_v62 }
 0x167   : > { %v526_v1 = vmul.f32 %v524_v63, %v503_v0 }
 0x169   : > { %944 = vmatprep.mubr.f32.mxu0 %v526_v1 }
 0x16a   : > { %945 = vmatmul.mubr.f32.vlgmr.msra.gmra.mxu0 %v527_v2 }
 0x22a   : > { %v946_v4 = vpop.f32.mrf.mxu0 }
 0x22b   : > { %v622_v6 = vadd.f32 %v946_v4, %v529_v3  ;;  %628 = sbr.rel (%p782_p7) target bundleno = 568 (0x238), region = 60 }
 0x22c   : > { %v612_v7 = vpop.f32.mrf.mxu0 }
 0x22d   : > { %624 = vst [vmem:[#allocation2 + $0x8] sm:$0xff] %v622_v6  ;;  %v621_v8 = vadd.f32 %v612_v7, %v528_v5 }
 0x22f   : > { %623 = vst [vmem:[#allocation2] sm:$0xff] %v621_v8 }
 0x234   : > { %v630_v10 = vld [vmem:[#allocation2 + $0x8] sm:$0xff] }
 0x235   : > { %632 = vst [vmem:[#allocation11 + $0x8] sm:$0xff] %v630_v10 }
 0x236   : > { %v629_v9 = vld [vmem:[#allocation2] sm:$0xff] }
 0x237   : > { %631 = vst [vmem:[#allocation11] sm:$0xff] %v629_v9 }
 0x238 PF: > { %p978_p2 = scmp.eq.s32.totalorder %s1361_s5, 1  ;;  %s1250_s7 = smov [#allocation11]  }
 0x239   : > { %s642_s11 = sshll.u32 %s1250_s7, 4  ;;  %s643_s11 = int_to_ptr.vmem [resolvable:$true] %s642_s11 }
 0x23a   : > { %s1154_s23 = scalar_lea.vmem %s643_s11, 256  ;;  %p1161_p4 = scmp.lt.s32.totalorder %s643_s11, %s643_s11 }
 0x23b   : > { %p1155_p5 = scmp.ne.s32.totalorder %s643_s11, %s1154_s23  ;;  %p1162_p9 = scmp.lt.s32.totalorder %s1154_s23, %s1154_s23 }
 0x23d   : > { %p1156_p8 = pnand %p1155_p5, %p978_p2  ;;  %p1163_p11 = por %p1162_p9, %p1161_p4 }
 0x23f   : > { %p1157_p3 = pneg %p1156_p8 }
 0x241   : > { %p1164_p12 = pnand %p1163_p11, %p1157_p3 }
 0x243   : > { %1167 = shalt.err (!%p1164_p12)
}
 0x244   : > { %s1251_s18 = smov 128   ;;  %s1252_s24 = smov 8  }
 0x245   : > { %958 = dma.vmem_to_hbm [thread:$0]  (%p978_p2), %s643_s11, 256, %s1539_s4, [#allocation5], %s1251_s18, %s1251_s18, %s1252_s24  }
 0x246   : > { %1215 = dma.done.wait (%p978_p2), [#allocation5], 256  }
 0x247   : > { %1217 = vsyncadd (%p978_p2), [#allocation5], 4294967040 }
 0x248 PF: > { %s22_s20 = sadd.s32 1, %s1240_s20   ;;  %s1545_s15 = smov %s1224_s16 }
 0x249   : > { %p19_p10 = scmp.ge.s32.totalorder %s22_s20, 4   ;;  %s1546_s16 = smov %s1228_s17 }
 0x24a   : > { %s1547_s17 = smov %s1325_s27  ;;  %s1548_s18 = smov %s1236_s19 }
 0x24b   : > { %s1549_s19 = smov %s1551_s21  ;;  %21 = sbr.rel (!%p19_p10) target bundleno = 8 (0x8), region = 112 }
 0x250   :  { %658 = vsyncpa [#allocation4], 1 }
 0x251   :  { %660 = vsyncpa [#allocation4 + $0x1], 1 }
 0x252   :  { %661 = vsyncpa [#allocation7], 1 }
 0x253   :  { %663 = vsyncpa [#allocation7 + $0x1], 1 }
 0x254   :  { %664 = vsyncpa [#allocation10], 1 }
 0x255   :  { %666 = vsyncpa [#allocation10 + $0x1], 1 }
 0x256   :  { %667 = vsyncpa [#allocation5], 1 }
 0x257   :  { %669 = vsyncpa [#allocation5 + $0x1], 1 }

</bundles_post_ra>
